<compile_context>
chip_gen: v7x
topology: tpu7x:2x2x1
jax: 0.10.0
libtpu: 0.0.40
codegen_flags: <defaults>
</compile_context>

<pallas_src>
import math

import jax
import jax.numpy as jnp
from jax.experimental import pallas as pl
from jax.experimental.pallas import tpu as pltpu

EPS = 1e-5
_LANES = 128
_SUBLANES = 8
_FUSED_LIMIT_F32_BYTES = 4 * 1024 * 1024   # threshold for the resident fast path


def _cdiv(a, b):
    return -(-a // b)


def _round_up(a, b):
    return (a + b - 1) // b * b


def _budgets():
    """(row-tile bytes, scoped-VMEM limit) picked per TPU generation."""
    tile_bytes, vmem_limit = 4 * 1024 * 1024, 32 * 1024 * 1024   # v7x-safe default
    try:
        if pltpu.get_tpu_info().vmem_capacity_bytes >= 128 * 1024 * 1024:  # v5e/v6e
            tile_bytes, vmem_limit = 6 * 1024 * 1024, 64 * 1024 * 1024
    except Exception:
        pass
    return tile_bytes, vmem_limit


# --------------------------- small-tensor fused path ---------------------------

def _fused_kernel(x_ref, gamma_ref, beta_ref, o_ref):
    """x stays resident in VMEM: compute centered stats, then normalize."""
    x = x_ref[...].astype(jnp.float32)                                # (N, H)
    mean = jnp.mean(x, axis=0, keepdims=True)                         # (1, H)
    var = jnp.mean(jnp.square(x - mean), axis=0, keepdims=True)       # biased
    scale = gamma_ref[...] * jax.lax.rsqrt(var + EPS)                 # (1, H)
    shift = beta_ref[...] - mean * scale
    o_ref[...] = (x * scale + shift).astype(o_ref.dtype)


# ------------------------------ two-pass path ---------------------------------

def _make_stats_kernel(rows, tn, tiles_per_core, need_mask):
    def kernel(x_ref, sum_ref, sq_ref):
        i = pl.program_id(1)

        @pl.when(i == 0)
        def _():
            sum_ref[...] = jnp.zeros_like(sum_ref)
            sq_ref[...] = jnp.zeros_like(sq_ref)

        x = x_ref[...].astype(jnp.float32)                            # (tn, Hp)
        if need_mask:
            # Mask rows past the logical end: covers both the ragged final tile
            # and the clamped "overflow" tiles of the parallel grid.  Zero rows
            # contribute 0 to both sums -> statistics stay exact.
            start = (pl.program_id(0) * tiles_per_core + i) * tn
            row_ids = jax.lax.broadcasted_iota(jnp.int32, x.shape, 0) + start
            x = jnp.where(row_ids < rows, x, 0.0)

        # Sublane-aligned partial sums: reduce over the leading axis only
        # (vreg-aligned VPU adds, no XLU cross-sublane reduce per step).
        xs = x.reshape(tn // _SUBLANES, _SUBLANES, x.shape[1])
        sum_ref[...] += jnp.sum(xs, axis=0)                           # (8, Hp)
        sq_ref[...] += jnp.sum(xs * xs, axis=0)                       # (8, Hp)

    return kernel


def _normalize_kernel(x_ref, scale_ref, shift_ref, o_ref):
    """y = x * scale + shift (fused per-channel affine; no centered temporary)."""
    x = x_ref[...].astype(jnp.float32)
    o_ref[...] = (x * scale_ref[...] + shift_ref[...]).astype(o_ref.dtype)


def batchnorm_pallas(x, gamma, beta):
    """x: (B, L, H); gamma, beta: (H,). Returns (B, L, H)."""
    B, L, H = x.shape
    N = B * L
    itemsize = jnp.dtype(x.dtype).itemsize
    tile_bytes, vmem_limit = _budgets()

    # ---------------- small-tensor fast path: single fused kernel ----------------
    if N * H * 4 <= _FUSED_LIMIT_F32_BYTES:
        x2 = x.reshape(N, H)
        y2 = pl.pallas_call(
            _fused_kernel,
            out_shape=jax.ShapeDtypeStruct((N, H), x.dtype),
            in_specs=[
                pl.BlockSpec(memory_space=pltpu.MemorySpace.VMEM),
                pl.BlockSpec(memory_space=pltpu.MemorySpace.VMEM),
                pl.BlockSpec(memory_space=pltpu.MemorySpace.VMEM),
            ],
            out_specs=pl.BlockSpec(memory_space=pltpu.MemorySpace.VMEM),
            compiler_params=pltpu.CompilerParams(vmem_limit_bytes=vmem_limit),
        )(x2,
          gamma.astype(jnp.float32).reshape(1, H),
          beta.astype(jnp.float32).reshape(1, H))
        return y2.reshape(B, L, H)

    # ---- lane packing: fold k row-groups into lanes so Hp is a multiple of 128 --
    k = 1
    k0 = _LANES // math.gcd(H, _LANES)
    if k0 > 1 and N % k0 == 0:
        k = k0
    rows = N // k
    Hp = H * k
    x2 = x.reshape(rows, Hp)          # contiguous reshape: no copy

    # ---- row tile: as large as the per-generation VMEM budget allows ------------
    tn = max(_SUBLANES, (tile_bytes // max(1, Hp * itemsize)) // _SUBLANES * _SUBLANES)
    tn = min(tn, _round_up(rows, _SUBLANES))
    tiles_total = _cdiv(rows, tn)

    # Split the stats pass across (up to) two TensorCores (v7x megacore); each
    # parallel slice owns its own (8, Hp) partial-sum blocks.
    num_cores = 2 if tiles_total >= 2 else 1
    tiles_per_core = _cdiv(tiles_total, num_cores)
    need_mask = (rows % tn != 0) or (num_cores * tiles_per_core != tiles_total)

    def x_stats_map(p, i):
        # Clamp overflow tiles of the rectangular grid onto the last valid tile;
        # their contribution is zeroed by the in-kernel row mask.
        return (jnp.minimum(p * tiles_per_core + i, tiles_total - 1), 0)

    # ------------------------- pass 1: per-channel statistics --------------------
    sum_p, sq_p = pl.pallas_call(
        _make_stats_kernel(rows, tn, tiles_per_core, need_mask),
        out_shape=(
            jax.ShapeDtypeStruct((num_cores * _SUBLANES, Hp), jnp.float32),
            jax.ShapeDtypeStruct((num_cores * _SUBLANES, Hp), jnp.float32),
        ),
        grid_spec=pl.GridSpec(
            grid=(num_cores, tiles_per_core),
            in_specs=[pl.BlockSpec((tn, Hp), x_stats_map)],
            out_specs=[
                pl.BlockSpec((_SUBLANES, Hp), lambda p, i: (p, 0)),
                pl.BlockSpec((_SUBLANES, Hp), lambda p, i: (p, 0)),
            ],
        ),
        compiler_params=pltpu.CompilerParams(
            dimension_semantics=("parallel", "arbitrary"),
            vmem_limit_bytes=vmem_limit,
        ),
        cost_estimate=pl.CostEstimate(
            flops=3 * rows * Hp,
            transcendentals=0,
            bytes_accessed=rows * Hp * itemsize + 2 * num_cores * _SUBLANES * Hp * 4,
        ),
    )(x2)

    # ---- fold partials / packed lane groups; fused per-channel scale & shift ----
    s = sum_p.sum(axis=0).reshape(k, H).sum(axis=0)        # (H,)
    ss = sq_p.sum(axis=0).reshape(k, H).sum(axis=0)        # (H,)
    n = float(N)
    mean = s / n
    var = jnp.maximum(ss / n - mean * mean, 0.0)           # biased var, clamped
    # TODO(synk): E[x^2]-mean^2 can lose precision when |mean| >> std; a
    # Welford-style per-tile (count, mean, M2) merge would be more robust there.
    scale = gamma.astype(jnp.float32) * jax.lax.rsqrt(var + EPS)   # (H,)
    shift = beta.astype(jnp.float32) - mean * scale                # (H,)
    if k > 1:
        scale = jnp.tile(scale, k)
        shift = jnp.tile(shift, k)
    scale = scale.reshape(1, Hp)
    shift = shift.reshape(1, Hp)

    # ------------------------------ pass 2: normalize ----------------------------
    y2 = pl.pallas_call(
        _normalize_kernel,
        out_shape=jax.ShapeDtypeStruct((rows, Hp), x.dtype),
        grid_spec=pl.GridSpec(
            grid=(tiles_total,),
            in_specs=[
                pl.BlockSpec((tn, Hp), lambda i: (i, 0)),
                pl.BlockSpec((1, Hp), lambda i: (0, 0)),
                pl.BlockSpec((1, Hp), lambda i: (0, 0)),
            ],
            out_specs=pl.BlockSpec((tn, Hp), lambda i: (i, 0)),
        ),
        compiler_params=pltpu.CompilerParams(
            dimension_semantics=("parallel",),   # independent row tiles (megacore)
            vmem_limit_bytes=vmem_limit,
        ),
        cost_estimate=pl.CostEstimate(
            flops=2 * rows * Hp,
            transcendentals=0,
            bytes_accessed=2 * rows * Hp * itemsize + 2 * Hp * 4,
        ),
    )(x2, scale, shift)

    return y2.reshape(B, L, H)


def batchnorm_ref(x, gamma, beta):
    # Pure-JAX reference of PyTorch training-mode BatchNorm1d over (B, L) dims.
    mean = jnp.mean(x, axis=(0, 1), keepdims=True)
    var = jnp.mean((x - mean) ** 2, axis=(0, 1), keepdims=True)   # biased
    return (x - mean) / jnp.sqrt(var + EPS) * gamma.reshape(1, 1, -1) + beta.reshape(1, 1, -1)


if __name__ == "__main__":
    bn = jax.jit(batchnorm_pallas)

    # Small shape consistent with the module: x is (batch, seq, hidden).
    B, L, H = 2, 8, 32
    x = jax.random.normal(jax.random.PRNGKey(0), (B, L, H), dtype=jnp.float32)
    gamma = jnp.ones((H,), dtype=jnp.float32)    # nn.BatchNorm1d default weight
    beta = jnp.zeros((H,), dtype=jnp.float32)    # nn.BatchNorm1d default bias

    out = jax.block_until_ready(bn(x, gamma, beta))
    ref = batchnorm_ref(x, gamma, beta)
    assert out.shape == (B, L, H)
    assert jnp.allclose(out, ref, atol=1e-5, rtol=1e-5), "small-shape mismatch"

    # Larger shape to exercise the tiled two-pass path: lane packing (H=96 -> k=4),
    # parallel partial-sum stats grid, ragged / clamped tiles (no padding copy).
    B2, L2, H2 = 8, 3000, 96
    k1, k2, k3 = jax.random.split(jax.random.PRNGKey(1), 3)
    x_big = jax.random.normal(k1, (B2, L2, H2), dtype=jnp.float32)
    gamma_big = jax.random.normal(k2, (H2,), dtype=jnp.float32)
    beta_big = jax.random.normal(k3, (H2,), dtype=jnp.float32)

    out_big = jax.block_until_ready(bn(x_big, gamma_big, beta_big))
    ref_big = batchnorm_ref(x_big, gamma_big, beta_big)
    assert out_big.shape == (B2, L2, H2)
    assert jnp.allclose(out_big, ref_big, atol=1e-4, rtol=1e-4), "tiled-path mismatch"

    print("KERNEL_OK")
</pallas_src>

<mosaic_0001>
module attributes {stable_mosaic.version = 11 : i64} {
  func.func @_fused_kernel(%arg0: memref<16x32xf32, #tpu.memory_space<vmem>>, %arg1: memref<1x32xf32, #tpu.memory_space<vmem>>, %arg2: memref<1x32xf32, #tpu.memory_space<vmem>>, %arg3: memref<16x32xf32, #tpu.memory_space<vmem>>) attributes {dimension_semantics = [], scalar_prefetch = 0 : i64, scratch_operands = 0 : i64, tpu.core_type = #tpu.core_type<tc>} {
    %c0 = arith.constant 0 : index
    %c0_0 = arith.constant 0 : index
    %0 = vector.load %arg0[%c0, %c0_0] : memref<16x32xf32, #tpu.memory_space<vmem>>, vector<16x32xf32>
    %cst = arith.constant dense<0.000000e+00> : vector<32xf32>
    %1 = vector.multi_reduction <add>, %0, %cst [0] : vector<16x32xf32> to vector<32xf32>
    %2 = vector.shape_cast %1 : vector<32xf32> to vector<1x32xf32>
    %cst_1 = arith.constant 1.600000e+01 : f32
    %3 = vector.broadcast %cst_1 : f32 to vector<1x32xf32>
    %4 = arith.divf %2, %3 : vector<1x32xf32>
    %5 = vector.broadcast %4 : vector<1x32xf32> to vector<16x32xf32>
    %6 = arith.subf %0, %5 : vector<16x32xf32>
    %7 = arith.mulf %6, %6 : vector<16x32xf32>
    %cst_2 = arith.constant dense<0.000000e+00> : vector<32xf32>
    %8 = vector.multi_reduction <add>, %7, %cst_2 [0] : vector<16x32xf32> to vector<32xf32>
    %9 = vector.shape_cast %8 : vector<32xf32> to vector<1x32xf32>
    %cst_3 = arith.constant 1.600000e+01 : f32
    %10 = vector.broadcast %cst_3 : f32 to vector<1x32xf32>
    %11 = arith.divf %9, %10 : vector<1x32xf32>
    %c0_4 = arith.constant 0 : index
    %c0_5 = arith.constant 0 : index
    %12 = vector.load %arg1[%c0_4, %c0_5] : memref<1x32xf32, #tpu.memory_space<vmem>>, vector<1x32xf32>
    %cst_6 = arith.constant 9.99999974E-6 : f32
    %13 = vector.broadcast %cst_6 : f32 to vector<1x32xf32>
    %14 = arith.addf %11, %13 : vector<1x32xf32>
    %15 = math.rsqrt %14 : vector<1x32xf32>
    %16 = arith.mulf %12, %15 : vector<1x32xf32>
    %c0_7 = arith.constant 0 : index
    %c0_8 = arith.constant 0 : index
    %17 = vector.load %arg2[%c0_7, %c0_8] : memref<1x32xf32, #tpu.memory_space<vmem>>, vector<1x32xf32>
    %18 = arith.mulf %4, %16 : vector<1x32xf32>
    %19 = arith.subf %17, %18 : vector<1x32xf32>
    %20 = vector.broadcast %16 : vector<1x32xf32> to vector<16x32xf32>
    %21 = arith.mulf %0, %20 : vector<16x32xf32>
    %22 = vector.broadcast %19 : vector<1x32xf32> to vector<16x32xf32>
    %23 = arith.addf %21, %22 : vector<16x32xf32>
    %c0_9 = arith.constant 0 : index
    %c0_10 = arith.constant 0 : index
    %24 = vector.load %arg3[%c0_9, %c0_10] : memref<16x32xf32, #tpu.memory_space<vmem>>, vector<16x32xf32>
    tpu.vector_store %arg3[%c0_9, %c0_10], %23 {strides = array<i32>} : memref<16x32xf32, #tpu.memory_space<vmem>>, vector<16x32xf32>,
    return
  }
}

</mosaic_0001>

<bundles_post_ra>
// kernel: batchnorm_pallas.1
= control target key start
LH: loop header
LB: loop body
LE: loop exit
PB: predicated region body
PF: predicated region fallthrough
CT: control target
= control target key end

     0   :  { %8 = vsyncpa [#allocation3], 0  ;;  %s219_s0 = inlined_call_operand.hbm [shape: f32[16,32], index: 0, kind: input, shape index: {}]   ;;  %s220_s1 = inlined_call_operand.vmem [shape: f32[1,32], index: 1, kind: input, shape index: {}]   ;;  %s221_s2 = inlined_call_operand.vmem [shape: f32[1,32], index: 2, kind: input, shape index: {}]   ;;  %s222_s3 = inlined_call_operand.hbm [shape: f32[16,32], index: 3, kind: output, shape index: {}]  }
   0x1   :  { %9 = vsyncpa [#allocation4], 0  ;;  %s153_s12 = smov [#allocation2]   ;;  %s105_s16 = scalar_lea.hbm %s219_s0, 256 }
   0x2   :  { %s15_s13 = sshll.u32 %s153_s12, 4  ;;  %p106_p0 = scmp.ne.s32.totalorder %s219_s0, %s105_s16  ;;  %s16_s13 = int_to_ptr.vmem [resolvable:$true] %s15_s13 }
   0x3   :  { %p109_p1 = scmp.lt.u32.totalorder %s105_s16, %s219_s0 }
   0x5   :  { %p111_p2 = pnand %p109_p1, %p106_p0 }
   0x7   :  { %114 = shalt.err (!%p111_p2)
}
   0x8   :  { %s115_s21 = scalar_lea.vmem %s16_s13, 256  ;;  %p120_p4 = scmp.lt.s32.totalorder %s16_s13, %s16_s13 }
   0x9   :  { %p116_p3 = scmp.ne.s32.totalorder %s16_s13, %s115_s21  ;;  %p121_p5 = scmp.lt.s32.totalorder %s115_s21, %s115_s21 }
   0xb   :  { %p122_p6 = por %p121_p5, %p120_p4 }
   0xd   :  { %p123_p7 = pnand %p122_p6, %p116_p3 }
   0xf   :  { %126 = shalt.err (!%p123_p7)
}
  0x10   :  { %s154_s22 = smov 128   ;;  %s155_s23 = smov 8  }
  0x11   :  { %21 = dma.hbm_to_vmem [thread:$0]  %s219_s0, 256, %s16_s13, [#allocation3], %s154_s22, %s154_s22, %s155_s23  }
  0x12   :  { %149 = dma.done.wait [#allocation3], 256  }
  0x13   :  { %150 = vsyncadd [#allocation3], 4294967040  ;;  %vm31_vm0 = vcmask 261120   ;;  %v29_v0 = vld [vmem:[#allocation2] sm:$0xff]  ;;  %v30_v1 = vld [vmem:[#allocation2 + $0x8] sm:$0xff]  ;;  %v65_v27 = vlaneseq  ;;  %s156_s29 = smov [#allocation5]  }
  0x14   :  { %v32_v2 = vsel %vm31_vm0, %v29_v0, 0.0  ;;  %v33_v3 = vsel %vm31_vm0, %v30_v1, 0.0  ;;  %v57_v29 = vld [vmem:[%s220_s1] sm:$0x1]  ;;  %s87_s30 = sshll.u32 %s156_s29, 4  ;;  %s88_s30 = int_to_ptr.vmem [resolvable:$true] %s87_s30 }
  0x15   :  { %v34_v4 = vadd.f32 %v33_v3, %v32_v2  ;;  %v66_v28 = vshrl.u32 %v65_v27, 7  ;;  %v61_v33 = vld [vmem:[%s221_s2] sm:$0x1]  ;;  %s127_s1 = scalar_lea.vmem %s88_s30, 256  ;;  %p132_p9 = scmp.lt.s32.totalorder %s88_s30, %s88_s30 }
  0x16   :  { %p128_p8 = scmp.ne.s32.totalorder %s88_s30, %s127_s1  ;;  %p133_p10 = scmp.lt.s32.totalorder %s127_s1, %s127_s1 }
  0x17   :  { %v35_v5 = vrot.slane %v34_v4, 4  ;;  %v67_v30 = vsub.s32 0, %v66_v28 }
  0x18   :  { %p134_p11 = por %p133_p10, %p132_p9 }
  0x19   :  { %v36_v6 = vadd.f32 %v35_v5, %v34_v4 }
  0x1a   :  { %p135_p12 = pnand %p134_p11, %p128_p8 }
  0x1b   :  { %v37_v7 = vrot.slane %v36_v6, 2 }
  0x1d   :  { %v38_v8 = vadd.f32 %v37_v7, %v36_v6 }
  0x1f   :  { %v39_v9 = vrot.slane %v38_v8, 1 }
  0x21   :  { %v40_v10 = vadd.f32 %v39_v9, %v38_v8 }
  0x23   :  { %v42_v11 = vmul.f32 0.0625, %v40_v10 }
  0x25   :  { %v43_v12 = vsub.f32 %v29_v0, %v42_v11  ;;  %v44_v13 = vsub.f32 %v30_v1, %v42_v11 }
  0x27   :  { %v45_v14 = vmul.f32 %v43_v12, %v43_v12  ;;  %v46_v15 = vmul.f32 %v44_v13, %v44_v13 }
  0x29   :  { %v47_v16 = vsel %vm31_vm0, %v45_v14, 0.0  ;;  %v48_v17 = vsel %vm31_vm0, %v46_v15, 0.0 }
  0x2a   :  { %v49_v18 = vadd.f32 %v48_v17, %v47_v16 }
  0x2c   :  { %v50_v19 = vrot.slane %v49_v18, 4 }
  0x2e   :  { %v51_v20 = vadd.f32 %v50_v19, %v49_v18 }
  0x30   :  { %v52_v21 = vrot.slane %v51_v20, 2 }
  0x32   :  { %v53_v22 = vadd.f32 %v52_v21, %v51_v20 }
  0x34   :  { %v54_v23 = vrot.slane %v53_v22, 1 }
  0x36   :  { %v55_v24 = vadd.f32 %v54_v23, %v53_v22 }
  0x38   :  { %v56_v25 = vmul.f32 0.0625, %v55_v24 }
  0x3a   :  { %v58_v26 = vadd.f32 1e-05, %v56_v25 }
  0x3c   :  { %103 = vrsqrt.f32 %v58_v26 }
  0x46   :  { %v104_v31 = vpop.eup %103 }
  0x47   :  { %v60_v32 = vmul.f32 %v104_v31, %v57_v29 }
  0x49   :  { %v62_v34 = vmul.f32 %v60_v32, %v42_v11  ;;  %v68_v35 = vrot.slane %v60_v32, %v67_v30 }
  0x4b   :  { %v63_v36 = vsub.f32 %v61_v33, %v62_v34  ;;  %v70_v37 = vmul.f32 %v68_v35, %v29_v0  ;;  %v71_v38 = vmul.f32 %v68_v35, %v30_v1 }
  0x4d   :  { %v76_v39 = vrot.slane %v63_v36, %v67_v30 }
  0x4f   :  { %v78_v40 = vadd.f32 %v76_v39, %v70_v37  ;;  %v79_v41 = vadd.f32 %v76_v39, %v71_v38 }
  0x51   :  { %80 = vst.msk [vmem:[#allocation5] sm:$0xff] %vm31_vm0, %v78_v40  ;;  %81 = vst.msk [vmem:[#allocation5 + $0x8] sm:$0xff] %vm31_vm0, %v79_v41 }
  0x52   :  { %138 = shalt.err (!%p135_p12)
}
  0x53   :  { %s139_s5 = scalar_lea.hbm %s222_s3, 256 }
  0x54   :  { %p140_p13 = scmp.ne.s32.totalorder %s222_s3, %s139_s5  ;;  %p143_p0 = scmp.lt.u32.totalorder %s139_s5, %s222_s3 }
  0x56   :  { %p145_p1 = pnand %p143_p0, %p140_p13 }
  0x58   :  { %148 = shalt.err (!%p145_p1)
}
  0x59   :  { %93 = dma.vmem_to_hbm [thread:$0]  %s88_s30, 256, %s222_s3, [#allocation4], %s154_s22, %s154_s22, %s155_s23  }
  0x5a   :  { %151 = dma.done.wait [#allocation4], 256  }
  0x5b   :  { %152 = vsyncadd [#allocation4], 4294967040 }
  0x5c   :  { %97 = vsyncpa [#allocation3], 1 }
  0x5d   :  { %98 = vsyncpa [#allocation4], 1 }

</bundles_post_ra>
